<compile_context>
chip_gen: v5e
topology: v5e:2x2
jax: 0.10.0
libtpu: 0.0.40
codegen_flags: <defaults>
</compile_context>

<pallas_src>
import functools
import math

import jax
import jax.numpy as jnp
from jax.experimental import pallas as pl
from jax.experimental.pallas import tpu as pltpu


def _round_up(x, m):
    return (x + m - 1) // m * m


# ---------------------------------------------------------------------------
# Kernel 1: row-wise L2 normalization (F.normalize(x, dim=-1), eps=1e-12),
# with sqrt(1/temperature) folded in so the main kernel's logits are already
# divided by the temperature.
# ---------------------------------------------------------------------------
def _normalize_kernel(x_ref, o_ref, *, scale):
    x = x_ref[...].astype(jnp.float32)                        # (T, D)
    ssq = jnp.sum(x * x, axis=-1, keepdims=True)              # (T, 1)
    # x / max(||x||, 1e-12) == x * rsqrt(max(||x||^2, 1e-24)); then * sqrt(1/T)
    inv = jax.lax.rsqrt(jnp.maximum(ssq, 1e-24)) * scale
    o_ref[...] = (x * inv).astype(o_ref.dtype)


def _l2_normalize(x, out_dtype, tile, scale):
    n, d = x.shape
    return pl.pallas_call(
        functools.partial(_normalize_kernel, scale=scale),
        out_shape=jax.ShapeDtypeStruct((n, d), out_dtype),
        grid=(n // tile,),
        in_specs=[pl.BlockSpec((tile, d), lambda i: (i, 0))],
        out_specs=pl.BlockSpec((tile, d), lambda i: (i, 0)),
        compiler_params=pltpu.CompilerParams(
            dimension_semantics=("parallel",)),
    )(x)


# ---------------------------------------------------------------------------
# Kernel 2: contrastive loss. Grid = (N_pad/tq,) over row tiles; the key axis
# is an in-kernel loop over tk-sized chunks of the VMEM-resident key matrix.
# ---------------------------------------------------------------------------
def _contrastive_kernel(q_ref, k_ref, labq_ref, labk_ref, o_ref, *,
                        tq, tk, n_chunks, pad_count, unroll):
    i = pl.program_id(0)
    q = q_ref[...]                                            # (tq, D)
    labq = labq_ref[...]                                      # (tq, 1) int32

    # Within-tile (row - col) pattern; the diagonal of chunk c (vs. row tile i)
    # is exactly where rows - cols == (c - i) * tk  (tq == tk by construction).
    rows = jax.lax.broadcasted_iota(jnp.int32, (tq, tk), 0)
    cols = jax.lax.broadcasted_iota(jnp.int32, (tq, tk), 1)
    dmat = rows - cols

    def body(c, carry):
        neg, pos, cnt = carry
        start = pl.multiple_of(c * tk, 128)
        kblk = k_ref[pl.ds(start, tk), :]                     # (tk, D)
        labk = labk_ref[:, pl.ds(start, tk)]                  # (1, tk)

        # (tq, D) x (tk, D), contracting dim 1 with dim 1 -> (tq, tk), no .T.
        logits = jax.lax.dot_general(
            q, kblk,
            dimension_numbers=(((1,), (1,)), ((), ())),
            preferred_element_type=jnp.float32)
        sim = jnp.exp(logits)                                 # already / T
        # Exact diagonal removal (robust to bf16 operands / f32 rounding).
        sim = jnp.where(dmat == (c - i) * tk, 0.0, sim)

        same = labq == labk                                   # (tq, tk)
        neg = neg + jnp.sum(sim, axis=-1, keepdims=True)
        pos = pos + jnp.sum(jnp.where(same, sim, 0.0), axis=-1, keepdims=True)
        cnt = cnt + jnp.sum(same.astype(jnp.float32), axis=-1, keepdims=True)
        return neg, pos, cnt

    zero = jnp.zeros((tq, 1), jnp.float32)
    neg, pos, cnt = jax.lax.fori_loop(0, n_chunks, body, (zero, zero, zero),
                                      unroll=unroll)

    # Padded key columns are zero vectors -> each contributed exactly exp(0)=1
    # to neg; remove them with a compile-time constant.
    neg = neg - pad_count
    # cnt includes self; guard degenerate rows (no positives) against NaN.
    cnt = jnp.maximum(cnt - 1.0, 1.0)
    pos = pos / cnt
    o_ref[...] = jnp.log(neg) - jnp.log(pos)                  # == -log(pos/neg)


def instance_contrastive_loss(out_1, label, temperature=0.5, compute_dtype=None):
    """out_1: (N, D) float array, label: (N,) int array -> scalar loss."""
    N, D = out_1.shape
    if compute_dtype is None:
        compute_dtype = out_1.dtype     # bf16 inputs stay bf16 for the MXU

    N_pad = _round_up(N, 128)
    D_pad = _round_up(D, 128)

    # Row tile (and in-kernel key chunk) size; keep >=2 row tiles when possible
    # so both TensorCores on v7x get work.
    tq = 256 if N_pad >= 512 else 128
    tk = tq
    n_chunks = N_pad // tk

    x = out_1
    if (N_pad, D_pad) != (N, D):
        x = jnp.pad(out_1, ((0, N_pad - N), (0, D_pad - D)))

    scale = math.sqrt(1.0 / float(temperature))
    xn = _l2_normalize(x, compute_dtype, tq, scale)           # (N_pad, D_pad)

    lab = jnp.pad(label.astype(jnp.int32), (0, N_pad - N), constant_values=-1)
    lab_col = lab.reshape(N_pad, 1)
    lab_row = lab.reshape(1, N_pad)

    kernel = functools.partial(
        _contrastive_kernel,
        tq=tq, tk=tk, n_chunks=n_chunks,
        pad_count=float(N_pad - N),
        unroll=bool(n_chunks <= 8),
    )

    per_row = pl.pallas_call(
        kernel,
        out_shape=jax.ShapeDtypeStruct((N_pad, 1), jnp.float32),
        grid=(N_pad // tq,),
        in_specs=[
            pl.BlockSpec((tq, D_pad), lambda i: (i, 0)),      # query rows
            pl.BlockSpec((N_pad, D_pad), lambda i: (0, 0)),   # resident keys
            pl.BlockSpec((tq, 1), lambda i: (i, 0)),          # labels (col)
            pl.BlockSpec((1, N_pad), lambda i: (0, 0)),       # labels (row)
        ],
        out_specs=pl.BlockSpec((tq, 1), lambda i: (i, 0)),
        compiler_params=pltpu.CompilerParams(
            dimension_semantics=("parallel",),
            # <= ~48 MiB keeps headroom on v7x's 64 MiB VMEM; far above what
            # typical FSL sizes need, and fine on v5e/v6e (128 MiB).
            vmem_limit_bytes=48 * 1024 * 1024,
        ),
    )(xn, xn, lab_col, lab_row)

    return jnp.mean(per_row[:N, 0])


def _reference_loss(out_1, label, temperature=0.5):
    """Pure-JAX reference mirroring the PyTorch module (balanced labels)."""
    x = out_1.astype(jnp.float32)
    n = x / jnp.maximum(jnp.linalg.norm(x, axis=-1, keepdims=True), 1e-12)
    sim = jnp.exp(n @ n.T / temperature)
    N = x.shape[0]
    off = ~jnp.eye(N, dtype=bool)
    neg = jnp.sum(jnp.where(off, sim, 0.0), axis=-1)
    pos_mask = (label[:, None] == label[None, :]) & off
    pos = jnp.sum(jnp.where(pos_mask, sim, 0.0), axis=-1) / jnp.sum(pos_mask, axis=-1)
    return jnp.mean(-jnp.log(pos / neg))


if __name__ == "__main__":
    key = jax.random.PRNGKey(0)

    # --- tiny case: exercises N padding (8->128) and D padding (32->128) ---
    N, D = 8, 32
    out_1 = jax.random.normal(key, (N, D), dtype=jnp.float32)
    # Balanced labels (required for masked_select(...).view(N, -1) to be valid)
    label = jnp.array([0, 0, 0, 0, 1, 1, 1, 1], dtype=jnp.int32)

    ref = _reference_loss(out_1, label, temperature=0.5)

    loss = instance_contrastive_loss(out_1, label, temperature=0.5)
    jax.block_until_ready(loss)
    assert jnp.allclose(loss, ref, rtol=1e-5, atol=1e-5), (loss, ref)

    # bf16 MXU-operand path (halves DMA/VMEM; diagonal handled exactly)
    loss_bf16 = instance_contrastive_loss(out_1, label, temperature=0.5,
                                          compute_dtype=jnp.bfloat16)
    jax.block_until_ready(loss_bf16)
    assert jnp.allclose(loss_bf16, ref, rtol=5e-2, atol=5e-2), (loss_bf16, ref)

    # --- moderate case: multiple row tiles + multiple in-kernel k-chunks,
    #     D padding 200 -> 256, no N padding ---
    N2, D2 = 256, 200
    k1, _ = jax.random.split(key)
    out_2 = jax.random.normal(k1, (N2, D2), dtype=jnp.float32)
    label_2 = jnp.repeat(jnp.arange(4, dtype=jnp.int32), N2 // 4)

    ref2 = _reference_loss(out_2, label_2, temperature=0.5)
    loss2 = instance_contrastive_loss(out_2, label_2, temperature=0.5)
    jax.block_until_ready(loss2)
    assert jnp.allclose(loss2, ref2, rtol=1e-4, atol=1e-4), (loss2, ref2)

    print("KERNEL_OK")
</pallas_src>

<mosaic_0001>
module attributes {stable_mosaic.version = 11 : i64} {
  func.func @_normalize_kernel(%arg0: i32, %arg1: memref<128x128xf32, #tpu.memory_space<vmem>>, %arg2: memref<128x128xf32, #tpu.memory_space<vmem>>) attributes {dimension_semantics = [#tpu.dimension_semantics<parallel>], iteration_bounds = array<i64: 1>, scalar_prefetch = 0 : i64, scratch_operands = 0 : i64, tpu.core_type = #tpu.core_type<tc>, window_params = [{transform_indices = @transform_0, window_bounds = array<i64: 128, 128>}, {transform_indices = @transform_1, window_bounds = array<i64: 128, 128>}]} {
    %c0 = arith.constant 0 : index
    %c0_0 = arith.constant 0 : index
    %0 = vector.load %arg1[%c0, %c0_0] : memref<128x128xf32, #tpu.memory_space<vmem>>, vector<128x128xf32>
    %1 = arith.mulf %0, %0 : vector<128x128xf32>
    %cst = arith.constant dense<0.000000e+00> : vector<128xf32>
    %2 = vector.multi_reduction <add>, %1, %cst [1] : vector<128x128xf32> to vector<128xf32>
    %3 = vector.shape_cast %2 : vector<128xf32> to vector<128x1xf32>
    %cst_1 = arith.constant 1.000000e-24 : f32
    %4 = vector.broadcast %cst_1 : f32 to vector<128x1xf32>
    %5 = arith.maximumf %3, %4 : vector<128x1xf32>
    %6 = math.rsqrt %5 : vector<128x1xf32>
    %cst_2 = arith.constant 1.41421354 : f32
    %7 = vector.broadcast %cst_2 : f32 to vector<128x1xf32>
    %8 = arith.mulf %6, %7 : vector<128x1xf32>
    %9 = vector.broadcast %8 : vector<128x1xf32> to vector<128x128xf32>
    %10 = arith.mulf %0, %9 : vector<128x128xf32>
    %c0_3 = arith.constant 0 : index
    %c0_4 = arith.constant 0 : index
    %11 = vector.load %arg2[%c0_3, %c0_4] : memref<128x128xf32, #tpu.memory_space<vmem>>, vector<128x128xf32>
    tpu.vector_store %arg2[%c0_3, %c0_4], %10 {strides = array<i32>} : memref<128x128xf32, #tpu.memory_space<vmem>>, vector<128x128xf32>,
    return
  }
  func.func @transform_0(%arg0: i32) -> (i32, i32) {
    %c0_i32 = arith.constant 0 : i32
    %c0_i32_0 = arith.constant 0 : i32
    return %arg0, %c0_i32 : i32, i32
  }
  func.func @transform_1(%arg0: i32) -> (i32, i32) {
    %c0_i32 = arith.constant 0 : i32
    %c0_i32_0 = arith.constant 0 : i32
    return %arg0, %c0_i32 : i32, i32
  }
}

</mosaic_0001>

<bundles_post_ra>
// kernel: tpu_custom_call.1
= control target key start
LH: loop header
LB: loop body
LE: loop exit
PB: predicated region body
PF: predicated region fallthrough
CT: control target
= control target key end

     0   :  { %6 = vsyncpa [#allocation3], 0  ;;  %s664_s0 = inlined_call_operand.hbm [shape: f32[128,128], index: 0, kind: input, shape index: {}]   ;;  %s665_s1 = inlined_call_operand.hbm [shape: f32[128,128], index: 1, kind: output, shape index: {}]  }
   0x1   :  { %7 = vsyncpa [#allocation4], 0  ;;  %s12_s8 = sshll.u32 %s664_s0, 4  ;;  %s420_s9 = smov [#allocation2]   ;;  %s13_s8 = int_to_ptr.hbm [resolvable:$true] %s12_s8 }
   0x2   :  { %s14_s10 = sshll.u32 %s420_s9, 4  ;;  %s421_s11 = smov 128   ;;  %s15_s10 = int_to_ptr.vmem [resolvable:$true] %s14_s10 }
   0x3   :  { %s422_s12 = smov 8  }
   0x4   :  { %20 = dma.hbm_to_vmem [thread:$0]  %s13_s8, 2048, %s15_s10, [#allocation3], %s421_s11, %s421_s11, %s422_s12  }
   0x5   :  { %416 = dma.done.wait [#allocation3], 2048  }
   0x6   :  { %417 = vsyncadd [#allocation3], 4294965248  ;;  %v440_v0 = vld [vmem:[#allocation2 + $0x20] sm:$0xff]  ;;  %v442_v1 = vld [vmem:[#allocation2 + $0x10] sm:$0xff]  ;;  %s423_s0 = smov [#allocation5]   ;;  %s319_s16 = sshll.u32 %s665_s1, 4  ;;  %s320_s16 = int_to_ptr.hbm [resolvable:$true] %s319_s16 }
   0x7   :  { %v444_v2 = vld [vmem:[#allocation2] sm:$0xff]  ;;  %v45_v3 = vmul.f32 %v440_v0, %v440_v0  ;;  %v43_v4 = vmul.f32 %v442_v1, %v442_v1  ;;  %v452_v6 = vld [vmem:[#allocation2 + $0x28] sm:$0xff]  ;;  %v454_v7 = vld [vmem:[#allocation2 + $0x18] sm:$0xff]  ;;  %s317_s13 = sshll.u32 %s423_s0, 4  ;;  %s318_s13 = int_to_ptr.vmem [resolvable:$true] %s317_s13 }
   0x8   :  { %v41_v5 = vmul.f32 %v444_v2, %v444_v2  ;;  %v456_v8 = vld [vmem:[#allocation2 + $0x8] sm:$0xff]  ;;  %v46_v9 = vmul.f32 %v452_v6, %v452_v6  ;;  %v44_v10 = vmul.f32 %v454_v7, %v454_v7  ;;  %v464_v12 = vld [vmem:[#allocation2 + $0x40] sm:$0xff]  ;;  %v466_v13 = vld [vmem:[#allocation2 + $0x38] sm:$0xff] }
   0x9   :  { %65 = vadd.xlane.f32.xlu2 %v45_v3  ;;  %61 = vadd.xlane.f32.xlu1 %v43_v4  ;;  %v42_v11 = vmul.f32 %v456_v8, %v456_v8  ;;  %v468_v14 = vld [vmem:[#allocation2 + $0x30] sm:$0xff]  ;;  %v49_v15 = vmul.f32 %v464_v12, %v464_v12  ;;  %v48_v16 = vmul.f32 %v466_v13, %v466_v13  ;;  %v476_v18 = vld [vmem:[#allocation2 + $0x58] sm:$0xff]  ;;  %v480_v20 = vld [vmem:[#allocation2 + $0x48] sm:$0xff] }
   0xa   :  { %57 = vadd.xlane.f32.xlu0 %v41_v5  ;;  %v47_v17 = vmul.f32 %v468_v14, %v468_v14  ;;  %v478_v19 = vld [vmem:[#allocation2 + $0x50] sm:$0xff]  ;;  %v52_v21 = vmul.f32 %v476_v18, %v476_v18  ;;  %v50_v23 = vmul.f32 %v480_v20, %v480_v20  ;;  %v490_v25 = vld [vmem:[#allocation2 + $0x68] sm:$0xff]  ;;  %v492_v26 = vld [vmem:[#allocation2 + $0x60] sm:$0xff] }
   0xb   :  { %v51_v22 = vmul.f32 %v478_v19, %v478_v19  ;;  %v488_v24 = vld [vmem:[#allocation2 + $0x70] sm:$0xff]  ;;  %v54_v28 = vmul.f32 %v490_v25, %v490_v25  ;;  %v53_v29 = vmul.f32 %v492_v26, %v492_v26  ;;  %v500_v30 = vld [vmem:[#allocation2 + $0x78] sm:$0xff] }
   0xc   :  { %v55_v27 = vmul.f32 %v488_v24, %v488_v24  ;;  %v56_v31 = vmul.f32 %v500_v30, %v500_v30 }
  0x11   :  { %67 = vadd.xlane.f32.xlu2 %v46_v9  ;;  %63 = vadd.xlane.f32.xlu1 %v44_v10 }
  0x12   :  { %59 = vadd.xlane.f32.xlu0 %v42_v11 }
  0x19   :  { %73 = vadd.xlane.f32.xlu2 %v49_v15  ;;  %71 = vadd.xlane.f32.xlu1 %v48_v16 }
  0x1a   :  { %69 = vadd.xlane.f32.xlu0 %v47_v17 }
  0x21   :  { %79 = vadd.xlane.f32.xlu2 %v52_v21  ;;  %77 = vadd.xlane.f32.xlu1 %v51_v22 }
  0x22   :  { %75 = vadd.xlane.f32.xlu0 %v50_v23 }
  0x29   :  { %85 = vadd.xlane.f32.xlu2 %v55_v27  ;;  %83 = vadd.xlane.f32.xlu1 %v54_v28 }
  0x2a   :  { %81 = vadd.xlane.f32.xlu0 %v53_v29 }
  0x32   :  { %87 = vadd.xlane.f32.xlu0 %v56_v31 }
  0x7c   :  { %v66_v32 = vpop.xlane.xlu2 %65  ;;  %v62_v33 = vpop.xlane.xlu1 %61 }
  0x7d   :  { %v93_v34 = vmax.f32 %v66_v32, 1e-24  ;;  %v91_v35 = vmax.f32 %v62_v33, 1e-24  ;;  %v58_v36 = vpop.xlane.xlu0 %57 }
  0x7e   :  { %v89_v37 = vmax.f32 %v58_v36, 1e-24 }
  0x7f   :  { %336 = vrsqrt.f32 %v93_v34  ;;  %vm151_vm0 = vweird.f32 %v93_v34  ;;  %vm131_vm1 = vweird.f32 %v91_v35 }
  0x80   :  { %338 = vrsqrt.f32 %v91_v35  ;;  %vm111_vm3 = vweird.f32 %v89_v37 }
  0x81   :  { %340 = vrsqrt.f32 %v89_v37 }
  0x84   :  { %v68_v38 = vpop.xlane.xlu2 %67  ;;  %v64_v39 = vpop.xlane.xlu1 %63 }
  0x85   :  { %v337_v40 = vpop.eup %336  ;;  %v504_v41 = vmax.f32 %v68_v38, 1e-24  ;;  %v506_v42 = vmax.f32 %v64_v39, 1e-24  ;;  %v60_v43 = vpop.xlane.xlu0 %59 }
  0x86   :  { %v339_v44 = vpop.eup %338  ;;  %v146_v45 = vmul.f32 %v337_v40, %v93_v34  ;;  %v508_v46 = vmax.f32 %v60_v43, 1e-24  ;;  %vm152_vm2 = vweird.f32 %v337_v40 }
  0x87   :  { %v341_v47 = vpop.eup %340  ;;  %v126_v48 = vmul.f32 %v339_v44, %v91_v35  ;;  %342 = vrsqrt.f32 %v504_v41  ;;  %vm132_vm4 = vweird.f32 %v339_v44  ;;  %vm161_vm5 = vweird.f32 %v504_v41  ;;  %vm153_vm7 = vmor %vm151_vm0, %vm152_vm2 }
  0x88   :  { %v147_v49 = vmul.f32 %v337_v40, %v146_v45  ;;  %v106_v50 = vmul.f32 %v341_v47, %v89_v37  ;;  %344 = vrsqrt.f32 %v506_v42  ;;  %vm112_vm6 = vweird.f32 %v341_v47  ;;  %vm133_vm8 = vmor %vm131_vm1, %vm132_vm4 }
  0x89   :  { %v127_v51 = vmul.f32 %v339_v44, %v126_v48  ;;  %346 = vrsqrt.f32 %v508_v46  ;;  %vm113_vm9 = vmor %vm111_vm3, %vm112_vm6  ;;  %vm141_vm10 = vweird.f32 %v506_v42  ;;  %vm121_vm15 = vweird.f32 %v508_v46 }
  0x8a   :  { %v148_v52 = vmul.f32 0.5, %v147_v49  ;;  %v107_v53 = vmul.f32 %v341_v47, %v106_v50 }
  0x8b   :  { %v128_v54 = vmul.f32 0.5, %v127_v51 }
  0x8c   :  { %v149_v55 = vsub.f32 1.5, %v148_v52  ;;  %v108_v56 = vmul.f32 0.5, %v107_v53  ;;  %v74_v57 = vpop.xlane.xlu2 %73  ;;  %v72_v58 = vpop.xlane.xlu1 %71 }
  0x8d   :  { %v513_v59 = vpop.eup %342  ;;  %v129_v60 = vsub.f32 1.5, %v128_v54  ;;  %v516_v61 = vmax.f32 %v74_v57, 1e-24  ;;  %v70_v62 = vpop.xlane.xlu0 %69  ;;  %v529_v15 = vmax.f32 %v72_v58, 1e-24 }
  0x8e   :  { %v518_v63 = vpop.eup %344  ;;  %v150_v3 = vmul.f32 %v337_v40, %v149_v55  ;;  %v109_v4 = vsub.f32 1.5, %v108_v56  ;;  %v156_v5 = vmul.f32 %v513_v59, %v504_v41  ;;  %vm162_vm11 = vweird.f32 %v513_v59 }
  0x8f   :  { %v522_v9 = vpop.eup %346  ;;  %v130_v10 = vmul.f32 %v339_v44, %v129_v60  ;;  %v136_v11 = vmul.f32 %v518_v63, %v506_v42  ;;  %348 = vrsqrt.f32 %v516_v61  ;;  %vm142_vm12 = vweird.f32 %v518_v63  ;;  %vm163_vm14 = vmor %vm161_vm5, %vm162_vm11 }
  0x90   :  { %v154_v16 = vsel %vm153_vm7, %v337_v40, %v150_v3  ;;  %v110_v17 = vmul.f32 %v341_v47, %v109_v4  ;;  %v157_v21 = vmul.f32 %v513_v59, %v156_v5  ;;  %v116_v22 = vmul.f32 %v522_v9, %v508_v46  ;;  %vm143_vm0 = vmor %vm141_vm10, %vm142_vm12 }
  0x91   :  { %v269_v23 = vmul.f32 1.4142135, %v154_v16  ;;  %v134_v27 = vsel %vm133_vm8, %v339_v44, %v130_v10  ;;  %v137_v28 = vmul.f32 %v518_v63, %v136_v11  ;;  %350 = vrsqrt.f32 %v529_v15 }
  0x92   :  { %v267_v29 = vmul.f32 1.4142135, %v134_v27  ;;  %v114_v31 = vsel %vm113_vm9, %v341_v47, %v110_v17  ;;  %v158_v32 = vmul.f32 0.5, %v157_v21  ;;  %v117_v33 = vmul.f32 %v522_v9, %v116_v22 }
  0x93   :  { %v285_v34 = vmul.f32 %v269_v23, %v440_v0  ;;  %v265_v35 = vmul.f32 1.4142135, %v114_v31  ;;  %v138_v36 = vmul.f32 0.5, %v137_v28  ;;  %v549_v0 = vmax.f32 %v70_v62, 1e-24 }
  0x94   :  { %v283_v38 = vmul.f32 %v267_v29, %v442_v1  ;;  %v159_v39 = vsub.f32 1.5, %v158_v32  ;;  %v118_v37 = vmul.f32 0.5, %v117_v33  ;;  %v80_v40 = vpop.xlane.xlu2 %79  ;;  %v78_v43 = vpop.xlane.xlu1 %77  ;;  %vm122_vm13 = vweird.f32 %v522_v9 }
  0x95   :  { %v545_v44 = vpop.eup %348  ;;  %301 = vst [vmem:[#allocation5 + $0x20] sm:$0xff] %v285_v34  ;;  %v281_v45 = vmul.f32 %v265_v35, %v444_v2  ;;  %v139_v47 = vsub.f32 1.5, %v138_v36  ;;  %v76_v48 = vpop.xlane.xlu0 %75  ;;  %352 = vrsqrt.f32 %v549_v0  ;;  %v562_v51 = vmax.f32 %v80_v40, 1e-24  ;;  %vm123_vm1 = vmor %vm121_vm15, %vm122_vm13 }
  0x96   :  { %299 = vst [vmem:[#allocation5 + $0x10] sm:$0xff] %v283_v38  ;;  %v160_v1 = vmul.f32 %v513_v59, %v159_v39  ;;  %v119_v49 = vsub.f32 1.5, %v118_v37  ;;  %v186_v50 = vmul.f32 %v545_v44, %v516_v61  ;;  %v571_v54 = vmax.f32 %v78_v43, 1e-24 }
  0x97   :  { %297 = vst [vmem:[#allocation5] sm:$0xff] %v281_v45  ;;  %v140_v2 = vmul.f32 %v518_v63, %v139_v47  ;;  %354 = vrsqrt.f32 %v562_v51  ;;  %v351_v56 = vpop.eup %350  ;;  %vm191_vm2 = vweird.f32 %v516_v61  ;;  %vm192_vm3 = vweird.f32 %v545_v44 }
  0x98   :  { %v164_v52 = vsel %vm163_vm14, %v513_v59, %v160_v1  ;;  %v120_v53 = vmul.f32 %v522_v9, %v119_v49  ;;  %v187_v41 = vmul.f32 %v545_v44, %v186_v50  ;;  %356 = vrsqrt.f32 %v571_v54  ;;  %vm193_vm4 = vmor %vm191_vm2, %vm192_vm3 }
  0x99   :  { %v270_v55 = vmul.f32 1.4142135, %v164_v52  ;;  %v144_v46 = vsel %vm143_vm0, %v518_v63, %v140_v2  ;;  %v176_v62 = vmul.f32 %v351_v56, %v529_v15  ;;  %v584_v4 = vmax.f32 %v76_v48, 1e-24 }
  0x9a   :  { %v268_v57 = vmul.f32 1.4142135, %v144_v46  ;;  %v124_v58 = vsel %vm123_vm1, %v522_v9, %v120_v53  ;;  %v188_v42 = vmul.f32 0.5, %v187_v41  ;;  %vm181_vm5 = vweird.f32 %v529_v15 }
  0x9b   :  { %v286_v59 = vmul.f32 %v270_v55, %v452_v6  ;;  %v266_v60 = vmul.f32 1.4142135, %v124_v58  ;;  %v353_v9 = vpop.eup %352  ;;  %v177_v16 = vmul.f32 %v351_v56, %v176_v62  ;;  %358 = vrsqrt.f32 %v584_v4 }
  0x9c   :  { %v284_v63 = vmul.f32 %v268_v57, %v454_v7  ;;  %v189_v3 = vsub.f32 1.5, %v188_v42  ;;  %v86_v5 = vpop.xlane.xlu2 %85  ;;  %v84_v10 = vpop.xlane.xlu1 %83  ;;  %v166_v21 = vmul.f32 %v353_v9, %v549_v0  ;;  %vm171_vm6 = vweird.f32 %v549_v0 }
  0x9d   :  { %302 = vst [vmem:[#allocation5 + $0x28] sm:$0xff] %v286_v59  ;;  %v282_v11 = vmul.f32 %v266_v60, %v456_v8  ;;  %v587_v6 = vmax.f32 %v86_v5, 1e-24  ;;  %v592_v7 = vmax.f32 %v84_v10, 1e-24  ;;  %v594_v22 = vpop.eup %354  ;;  %v178_v8 = vmul.f32 0.5, %v177_v16  ;;  %v82_v23 = vpop.xlane.xlu0 %81 }
  0x9e   :  { %300 = vst [vmem:[#allocation5 + $0x18] sm:$0xff] %v284_v63  ;;  %v190_v17 = vmul.f32 %v545_v44, %v189_v3  ;;  %v357_v27 = vpop.eup %356  ;;  %v167_v29 = vmul.f32 %v353_v9, %v166_v21  ;;  %v216_v31 = vmul.f32 %v594_v22, %v562_v51  ;;  %vm221_vm7 = vweird.f32 %v562_v51 }
  0x9f   :  { %298 = vst [vmem:[#allocation5 + $0x8] sm:$0xff] %v282_v11  ;;  %360 = vrsqrt.f32 %v587_v6  ;;  %v179_v61 = vsub.f32 1.5, %v178_v8  ;;  %vm182_vm8 = vweird.f32 %v351_v56  ;;  %v206_v33 = vmul.f32 %v357_v27, %v571_v54 }
  0xa0   :  { %v194_v28 = vsel %vm193_vm4, %v545_v44, %v190_v17  ;;  %v168_v34 = vmul.f32 0.5, %v167_v29  ;;  %v217_v35 = vmul.f32 %v594_v22, %v216_v31  ;;  %vm211_vm9 = vweird.f32 %v571_v54  ;;  %vm183_vm10 = vmor %vm181_vm5, %vm182_vm8 }
  0xa1   :  { %v273_v32 = vmul.f32 1.4142135, %v194_v28  ;;  %362 = vrsqrt.f32 %v592_v7  ;;  %v180_v38 = vmul.f32 %v351_v56, %v179_v61  ;;  %v207_v39 = vmul.f32 %v357_v27, %v206_v33  ;;  %v614_v40 = vpop.eup %358 }
  0xa2   :  { %v612_v37 = vmax.f32 %v82_v23, 1e-24  ;;  %v169_v43 = vsub.f32 1.5, %v168_v34  ;;  %vm172_vm11 = vweird.f32 %v353_v9  ;;  %v218_v44 = vmul.f32 0.5, %v217_v35 }
  0xa3   :  { %v289_v36 = vmul.f32 %v273_v32, %v464_v12  ;;  %vm251_vm12 = vweird.f32 %v587_v6  ;;  %v184_v47 = vsel %vm183_vm10, %v351_v56, %v180_v38  ;;  %vm222_vm13 = vweird.f32 %v594_v22  ;;  %vm173_vm14 = vmor %vm171_vm6, %vm172_vm11 }
  0xa4   :  { %v208_v12 = vmul.f32 0.5, %v207_v39  ;;  %v196_v48 = vmul.f32 %v614_v40, %v584_v4  ;;  %v272_v1 = vmul.f32 1.4142135, %v184_v47  ;;  %v170_v49 = vmul.f32 %v353_v9, %v169_v43  ;;  %vm223_vm0 = vmor %vm221_vm7, %vm222_vm13 }
  0xa5   :  { %v361_v45 = vpop.eup %360  ;;  %305 = vst [vmem:[#allocation5 + $0x40] sm:$0xff] %v289_v36  ;;  %v219_v50 = vsub.f32 1.5, %v218_v44  ;;  %vm212_vm15 = vweird.f32 %v357_v27  ;;  %364 = vrsqrt.f32 %v612_v37  ;;  %v88_v59 = vpop.xlane.xlu0 %87  ;;  %vm202_vm2 = vweird.f32 %v614_v40 }
  0xa6   :  { %v246_v15 = vmul.f32 %v361_v45, %v587_v6  ;;  %v209_v2 = vsub.f32 1.5, %v208_v12  ;;  %v197_v52 = vmul.f32 %v614_v40, %v196_v48  ;;  %v288_v41 = vmul.f32 %v272_v1, %v466_v13  ;;  %vm213_vm1 = vmor %vm211_vm9, %vm212_vm15 }
  0xa7   :  { %v363_v53 = vpop.eup %362  ;;  %v174_v55 = vsel %vm173_vm14, %v353_v9, %v170_v49  ;;  %v220_v46 = vmul.f32 %v594_v22, %v219_v50  ;;  %vm252_vm3 = vweird.f32 %v361_v45  ;;  %v104_v11 = vmax.f32 %v88_v59, 1e-24 }
  0xa8   :  { %v247_v56 = vmul.f32 %v361_v45, %v246_v15  ;;  %v271_v57 = vmul.f32 1.4142135, %v174_v55  ;;  %v210_v0 = vmul.f32 %v357_v27, %v209_v2  ;;  %v198_v58 = vmul.f32 0.5, %v197_v52  ;;  %304 = vst [vmem:[#allocation5 + $0x38] sm:$0xff] %v288_v41  ;;  %vm253_vm6 = vmor %vm251_vm12, %vm252_vm3 }
  0xa9   :  { %v236_v42 = vmul.f32 %v363_v53, %v592_v7  ;;  %v224_v60 = vsel %vm223_vm0, %v594_v22, %v220_v46  ;;  %vm201_vm4 = vweird.f32 %v584_v4  ;;  %vm241_vm7 = vweird.f32 %v592_v7 }
  0xaa   :  { %v248_v13 = vmul.f32 0.5, %v247_v56  ;;  %v287_v62 = vmul.f32 %v271_v57, %v468_v14  ;;  %v276_v51 = vmul.f32 1.4142135, %v224_v60  ;;  %v214_v63 = vsel %vm213_vm1, %v357_v27, %v210_v0  ;;  %vm203_vm5 = vmor %vm201_vm4, %vm202_vm2 }
  0xab   :  { %v199_v3 = vsub.f32 1.5, %v198_v58  ;;  %v275_v5 = vmul.f32 1.4142135, %v214_v63  ;;  %v237_v9 = vmul.f32 %v363_v53, %v236_v42  ;;  %v365_v16 = vpop.eup %364  ;;  %vm242_vm8 = vweird.f32 %v363_v53 }
  0xac   :  { %v249_v10 = vsub.f32 1.5, %v248_v13  ;;  %303 = vst [vmem:[#allocation5 + $0x30] sm:$0xff] %v287_v62  ;;  %v292_v17 = vmul.f32 %v276_v51, %v476_v18  ;;  %v226_v8 = vmul.f32 %v365_v16, %v612_v37  ;;  %366 = vrsqrt.f32 %v104_v11  ;;  %vm243_vm9 = vmor %vm241_vm7, %vm242_vm8 }
  0xad   :  { %v200_v54 = vmul.f32 %v614_v40, %v199_v3  ;;  %v291_v21 = vmul.f32 %v275_v5, %v478_v19  ;;  %v238_v22 = vmul.f32 0.5, %v237_v9  ;;  %vm232_vm10 = vweird.f32 %v365_v16 }
  0xae   :  { %v250_v14 = vmul.f32 %v361_v45, %v249_v10  ;;  %308 = vst [vmem:[#allocation5 + $0x58] sm:$0xff] %v292_v17  ;;  %v227_v27 = vmul.f32 %v365_v16, %v226_v8  ;;  %vm231_vm11 = vweird.f32 %v612_v37  ;;  %vm261_vm14 = vweird.f32 %v104_v11 }
  0xaf   :  { %v204_v23 = vsel %vm203_vm5, %v614_v40, %v200_v54  ;;  %307 = vst [vmem:[#allocation5 + $0x50] sm:$0xff] %v291_v21  ;;  %v239_v4 = vsub.f32 1.5, %v238_v22  ;;  %vm233_vm12 = vmor %vm231_vm11, %vm232_vm10 }
  0xb0   :  { %v274_v18 = vmul.f32 1.4142135, %v204_v23  ;;  %v254_v19 = vsel %vm253_vm6, %v361_v45, %v250_v14  ;;  %v228_v32 = vmul.f32 0.5, %v227_v27 }
  0xb1   :  { %v279_v28 = vmul.f32 1.4142135, %v254_v19  ;;  %v240_v31 = vmul.f32 %v363_v53, %v239_v4 }
  0xb2   :  { %v290_v29 = vmul.f32 %v274_v18, %v480_v20  ;;  %v229_v33 = vsub.f32 1.5, %v228_v32  ;;  %v367_v7 = vpop.eup %366 }
  0xb3   :  { %v295_v61 = vmul.f32 %v279_v28, %v488_v24  ;;  %v244_v6 = vsel %vm243_vm9, %v363_v53, %v240_v31  ;;  %v256_v36 = vmul.f32 %v367_v7, %v104_v11  ;;  %vm262_vm13 = vweird.f32 %v367_v7 }
  0xb4   :  { %306 = vst [vmem:[#allocation5 + $0x48] sm:$0xff] %v290_v29  ;;  %v278_v34 = vmul.f32 1.4142135, %v244_v6  ;;  %v230_v35 = vmul.f32 %v365_v16, %v229_v33  ;;  %vm263_vm15 = vmor %vm261_vm14, %vm262_vm13 }
  0xb5   :  { %311 = vst [vmem:[#allocation5 + $0x70] sm:$0xff] %v295_v61  ;;  %v257_v39 = vmul.f32 %v367_v7, %v256_v36 }
  0xb6   :  { %v294_v38 = vmul.f32 %v278_v34, %v490_v25  ;;  %v234_v20 = vsel %vm233_vm12, %v365_v16, %v230_v35 }
  0xb7   :  { %v277_v40 = vmul.f32 1.4142135, %v234_v20  ;;  %v258_v24 = vmul.f32 0.5, %v257_v39 }
  0xb8   :  { %310 = vst [vmem:[#allocation5 + $0x68] sm:$0xff] %v294_v38 }
  0xb9   :  { %v293_v43 = vmul.f32 %v277_v40, %v492_v26  ;;  %v259_v44 = vsub.f32 1.5, %v258_v24 }
  0xbb   :  { %309 = vst [vmem:[#allocation5 + $0x60] sm:$0xff] %v293_v43  ;;  %v260_v45 = vmul.f32 %v367_v7, %v259_v44 }
  0xbd   :  { %v264_v47 = vsel %vm263_vm15, %v367_v7, %v260_v45 }
  0xbe   :  { %v280_v25 = vmul.f32 1.4142135, %v264_v47 }
  0xc0   :  { %v296_v37 = vmul.f32 %v280_v25, %v500_v30 }
  0xc2   :  { %312 = vst [vmem:[#allocation5 + $0x78] sm:$0xff] %v296_v37 }
  0xc3   :  { %325 = dma.vmem_to_hbm [thread:$0]  %s318_s13, 2048, %s320_s16, [#allocation4], %s421_s11, %s421_s11, %s422_s12  }
  0xc4   :  { %418 = dma.done.wait [#allocation4], 2048  }
  0xc5   :  { %419 = vsyncadd [#allocation4], 4294965248 }
  0xc6   :  { %330 = vsyncpa [#allocation3], 1 }
  0xc7   :  { %331 = vsyncpa [#allocation4], 1 }

</bundles_post_ra>
